<compile_context>
chip_gen: v6e
topology: v6e:2x2x1
jax: 0.10.0
libtpu: 0.0.40
codegen_flags: <defaults>
</compile_context>

<pallas_src>
import jax
import jax.numpy as jnp
from jax.experimental import pallas as pl
from jax.experimental.pallas import tpu as pltpu


def _scaling_kernel(shift_ref, scale_ref, x_ref, o_ref):
    # shift_ref / scale_ref: (rows, 1) VMEM; x_ref / o_ref: (rows, bs) VMEM tiles.
    o_ref[...] = ((x_ref[...] - shift_ref[...]) / scale_ref[...]).astype(o_ref.dtype)


def _round_up(a: int, b: int) -> int:
    return ((a + b - 1) // b) * b


def scaling_layer(x: jax.Array, shift: jax.Array, scale: jax.Array,
                  *, target_block_bytes: int = 4 << 20) -> jax.Array:
    """(x - shift) / scale with per-channel shift/scale; x is NCHW."""
    N, C, H, W = x.shape
    rows = N * C
    S = H * W
    itemsize = jnp.dtype(x.dtype).itemsize

    # Lane-dense tile width: multiple of 128 lanes, as wide as the VMEM budget
    # allows (double-buffered input + output => ~4x block bytes resident).
    S_pad = _round_up(S, 128)
    bs = max(128, (target_block_bytes // (rows * itemsize)) // 128 * 128)
    bs = min(bs, S_pad)
    # If the whole slab fits in one tile but is big enough to matter, split it
    # so the "parallel" grid axis has >=2 steps (shards across v7x's two TCs).
    if bs >= S_pad and S_pad >= 256 and rows * S_pad * itemsize >= (1 << 20):
        bs = _round_up((S_pad + 1) // 2, 128)
    num_tiles = pl.cdiv(S_pad, bs)

    # Flatten to (N*C, S) and zero-pad the lane dim up to a multiple of 128.
    x2 = x.reshape(rows, S)
    if S_pad != S:
        x2 = jnp.pad(x2, ((0, 0), (0, S_pad - S)))

    # Per-row (n, c) parameters; channel varies fastest, matching the reshape.
    shift_rows = jnp.tile(shift.reshape(1, C).astype(jnp.float32), (N, 1)).reshape(rows, 1)
    scale_rows = jnp.tile(scale.reshape(1, C).astype(jnp.float32), (N, 1)).reshape(rows, 1)

    block_bytes = rows * bs * itemsize
    # Explicit VMEM cap: stays well under v7x's 64 MiB physical while letting
    # v5e/v6e use big tiles without hitting the scoped default.
    vmem_limit = int(min(48 << 20, max(8 << 20, 6 * block_bytes)))

    out = pl.pallas_call(
        _scaling_kernel,
        out_shape=jax.ShapeDtypeStruct((rows, S_pad), x.dtype),
        grid_spec=pltpu.PrefetchScalarGridSpec(
            num_scalar_prefetch=0,
            grid=(num_tiles,),
            in_specs=[
                pl.BlockSpec((rows, 1), lambda j: (0, 0)),    # per-row shift
                pl.BlockSpec((rows, 1), lambda j: (0, 0)),    # per-row scale
                pl.BlockSpec((rows, bs), lambda j: (0, j)),   # x lane-tile
            ],
            out_specs=pl.BlockSpec((rows, bs), lambda j: (0, j)),
        ),
        compiler_params=pltpu.CompilerParams(
            dimension_semantics=("parallel",),
            vmem_limit_bytes=vmem_limit,
        ),
    )(shift_rows, scale_rows, x2)

    return out[:, :S].reshape(N, C, H, W)


if __name__ == "__main__":
    # Deterministic buffers from the module's __init__ ([1,3,1,1] in torch,
    # stored flat as (3,) here and expanded per-(n,c) row in the wrapper).
    shift = jnp.array([-0.030, -0.088, -0.188], dtype=jnp.float32)
    scale = jnp.array([0.458, 0.448, 0.450], dtype=jnp.float32)

    key = jax.random.PRNGKey(0)
    x = jax.random.normal(key, (2, 3, 16, 16), dtype=jnp.float32)  # NCHW

    out = jax.block_until_ready(scaling_layer(x, shift, scale))
    ref = (x - shift[None, :, None, None]) / scale[None, :, None, None]
    assert out.shape == x.shape and out.dtype == x.dtype
    assert jnp.allclose(out, ref, rtol=1e-6, atol=1e-6)

    # Also exercise the non-multiple-of-128 spatial path (padding branch).
    x_odd = jax.random.normal(jax.random.PRNGKey(0), (2, 3, 10, 10), dtype=jnp.float32)
    out_odd = jax.block_until_ready(scaling_layer(x_odd, shift, scale))
    ref_odd = (x_odd - shift[None, :, None, None]) / scale[None, :, None, None]
    assert jnp.allclose(out_odd, ref_odd, rtol=1e-6, atol=1e-6)

    print("KERNEL_OK")
</pallas_src>

<mosaic_0001>
module attributes {stable_mosaic.version = 11 : i64} {
  func.func @_scaling_kernel(%arg0: i32, %arg1: memref<6x1xf32, #tpu.memory_space<vmem>>, %arg2: memref<6x1xf32, #tpu.memory_space<vmem>>, %arg3: memref<6x256xf32, #tpu.memory_space<vmem>>, %arg4: memref<6x256xf32, #tpu.memory_space<vmem>>) attributes {dimension_semantics = [#tpu.dimension_semantics<parallel>], iteration_bounds = array<i64: 1>, scalar_prefetch = 0 : i64, scratch_operands = 0 : i64, tpu.core_type = #tpu.core_type<tc>, window_params = [{pipeline_mode = #tpu.pipeline_mode<synchronous>, transform_indices = @transform_0, window_bounds = array<i64: 6, 1>}, {pipeline_mode = #tpu.pipeline_mode<synchronous>, transform_indices = @transform_1, window_bounds = array<i64: 6, 1>}, {transform_indices = @transform_2, window_bounds = array<i64: 6, 256>}, {transform_indices = @transform_3, window_bounds = array<i64: 6, 256>}]} {
    %c0 = arith.constant 0 : index
    %c0_0 = arith.constant 0 : index
    %0 = vector.load %arg3[%c0, %c0_0] : memref<6x256xf32, #tpu.memory_space<vmem>>, vector<6x256xf32>
    %c0_1 = arith.constant 0 : index
    %c0_2 = arith.constant 0 : index
    %1 = vector.load %arg1[%c0_1, %c0_2] : memref<6x1xf32, #tpu.memory_space<vmem>>, vector<6x1xf32>
    %2 = vector.broadcast %1 : vector<6x1xf32> to vector<6x256xf32>
    %3 = arith.subf %0, %2 : vector<6x256xf32>
    %c0_3 = arith.constant 0 : index
    %c0_4 = arith.constant 0 : index
    %4 = vector.load %arg2[%c0_3, %c0_4] : memref<6x1xf32, #tpu.memory_space<vmem>>, vector<6x1xf32>
    %5 = vector.broadcast %4 : vector<6x1xf32> to vector<6x256xf32>
    %6 = arith.divf %3, %5 : vector<6x256xf32>
    %c0_5 = arith.constant 0 : index
    %c0_6 = arith.constant 0 : index
    %7 = vector.load %arg4[%c0_5, %c0_6] : memref<6x256xf32, #tpu.memory_space<vmem>>, vector<6x256xf32>
    tpu.vector_store %arg4[%c0_5, %c0_6], %6 {strides = array<i32>} : memref<6x256xf32, #tpu.memory_space<vmem>>, vector<6x256xf32>,
    return
  }
  func.func @transform_0(%arg0: i32) -> (i32, i32) {
    %c0_i32 = arith.constant 0 : i32
    %c0_i32_0 = arith.constant 0 : i32
    %c0_i32_1 = arith.constant 0 : i32
    return %c0_i32, %c0_i32_0 : i32, i32
  }
  func.func @transform_1(%arg0: i32) -> (i32, i32) {
    %c0_i32 = arith.constant 0 : i32
    %c0_i32_0 = arith.constant 0 : i32
    %c0_i32_1 = arith.constant 0 : i32
    return %c0_i32, %c0_i32_0 : i32, i32
  }
  func.func @transform_2(%arg0: i32) -> (i32, i32) {
    %c0_i32 = arith.constant 0 : i32
    %c0_i32_0 = arith.constant 0 : i32
    return %c0_i32, %arg0 : i32, i32
  }
  func.func @transform_3(%arg0: i32) -> (i32, i32) {
    %c0_i32 = arith.constant 0 : i32
    %c0_i32_0 = arith.constant 0 : i32
    return %c0_i32, %arg0 : i32, i32
  }
}

</mosaic_0001>

<bundles_post_ra>
// kernel: tpu_custom_call.1
= control target key start
LH: loop header
LB: loop body
LE: loop exit
PB: predicated region body
PF: predicated region fallthrough
CT: control target
= control target key end

     0   :  { %v77_v1 = vmov 0   ;;  %s114_s0 = inlined_call_operand.vmem [shape: f32[6,1], index: 0, kind: input, shape index: {}]   ;;  %s115_s1 = inlined_call_operand.vmem [shape: f32[6,1], index: 1, kind: input, shape index: {}]   ;;  %s116_s2 = inlined_call_operand.vmem [shape: f32[6,256], index: 2, kind: input, shape index: {}]   ;;  %s117_s3 = inlined_call_operand.hbm [shape: f32[6,256], index: 3, kind: output, shape index: {}]  }
   0x1   :  { %v25_v0 = vld [vmem:[%s115_s1] sm:$0x3f]  ;;  %52 = vset.pattern.permute.xlu0 %v77_v1 }
   0x2   :  { %8 = vsyncpa [#allocation3], 0  ;;  %28 = vperm.xlu0 %52, %v25_v0   ;;  %v17_v2 = vld [vmem:[%s114_s0] sm:$0x3f]  ;;  %v16_v6 = vld [vmem:[%s116_s2 + $0x8] sm:$0x3f] }
   0x3   :  { %v15_v5 = vld [vmem:[%s116_s2] sm:$0x3f]  ;;  %s78_s1 = smov [#allocation2]  }
   0x4   :  { %s42_s20 = sshll.u32 %s78_s1, 4  ;;  %s43_s20 = int_to_ptr.vmem [resolvable:$true] %s42_s20 }
   0x5   :  { %s55_s0 = scalar_lea.vmem %s43_s20, 256  ;;  %p60_p1 = scmp.lt.s32.totalorder %s43_s20, %s43_s20 }
   0x6   :  { %20 = vperm.xlu0 %52, %v17_v2   ;;  %p56_p0 = scmp.ne.s32.totalorder %s43_s20, %s55_s0  ;;  %p61_p2 = scmp.lt.s32.totalorder %s55_s0, %s55_s0 }
   0x8   :  { %p62_p3 = por %p61_p2, %p60_p1 }
   0xa   :  { %p63_p4 = pnand %p62_p3, %p56_p0 }
  0x7d   :  { %v29_v3 = vpop.permute.xlu0 %28 }
  0x7e   :  { %53 = vrcp.f32 %v29_v3 }
  0x81   :  { %v21_v4 = vpop.permute.xlu0 %20 }
  0x82   :  { %v23_v7 = vsub.f32 %v15_v5, %v21_v4  ;;  %v24_v8 = vsub.f32 %v16_v6, %v21_v4 }
  0x8b   :  { %v54_v9 = vpop.eup %53 }
  0x8c   :  { %v32_v10 = vmul.f32 %v54_v9, %v23_v7  ;;  %v33_v11 = vmul.f32 %v54_v9, %v24_v8 }
  0x8e   :  { %34 = vst [vmem:[#allocation2] sm:$0x3f] %v32_v10  ;;  %35 = vst [vmem:[#allocation2 + $0x8] sm:$0x3f] %v33_v11 }
  0x8f   :  { %66 = shalt.err (!%p63_p4)
}
  0x90   :  { %45 = dma.vmem_to_hbm [thread:$0]  %s43_s20, 256, %s117_s3, [#allocation3]  }
  0x91   :  { %75 = dma.done.wait [#allocation3], 256  }
  0x92   :  { %76 = vsyncadd [#allocation3], 4294967040 }
  0x93   :  { %49 = vsyncpa [#allocation3], 1 }

</bundles_post_ra>
